<compile_context>
chip_gen: v7x
topology: tpu7x:2x2x1
jax: 0.10.0
libtpu: 0.0.40
codegen_flags: <defaults>
</compile_context>

<pallas_src>
import functools
import math

import jax
import jax.numpy as jnp
from jax.experimental import pallas as pl
from jax.experimental.pallas import tpu as pltpu


# ---------------------------------------------------------------------------
# Tile-size helpers: pick the biggest block that fits a conservative VMEM
# budget (double-buffered), so the same choice is safe on v5e / v6e / v7x.
# ---------------------------------------------------------------------------
def _pick_row_tile(n, d_in, d_out, itemsize=4, budget=8 * 1024 * 1024, cap=1024):
    def fits(t):
        return 2 * t * (d_in + d_out) * itemsize <= budget

    if n <= cap and fits(n):
        return n
    t = (min(cap, n) // 8) * 8
    while t >= 8:
        if n % t == 0 and fits(t):
            return t
        t -= 8
    return n  # fall back to a single full block


def _pick_head_block(bh, sq, sk, d_k, itemsize=4, budget=8 * 1024 * 1024):
    # per fused (batch*head) row: double-buffered q/o (sq*d_k) + k/v (sk*d_k)
    # plus the f32 scores/probs intermediates (sq*sk).
    per = (2 * 2 * (sq + sk) * d_k + 2 * sq * sk) * itemsize
    hb = 1
    for cand in range(1, bh + 1):
        if bh % cand == 0 and cand * per <= budget:
            hb = cand
    return hb


# ---------------------------------------------------------------------------
# Row-tiled linear kernel:  y = x @ W + b   (bias fused into the epilogue)
# ---------------------------------------------------------------------------
def _linear_kernel(x_ref, w_ref, b_ref, o_ref):
    acc = jnp.dot(x_ref[...].astype(jnp.float32),
                  w_ref[...].astype(jnp.float32),
                  preferred_element_type=jnp.float32)
    o_ref[...] = (acc + b_ref[...].astype(jnp.float32)).astype(o_ref.dtype)


def linear_pallas(x2d, w, b):
    n, d_in = x2d.shape
    d_out = w.shape[1]
    tm = _pick_row_tile(n, d_in, d_out, itemsize=x2d.dtype.itemsize)
    b2 = b.reshape(1, d_out)
    return pl.pallas_call(
        _linear_kernel,
        out_shape=jax.ShapeDtypeStruct((n, d_out), x2d.dtype),
        grid_spec=pltpu.PrefetchScalarGridSpec(
            num_scalar_prefetch=0,
            grid=(n // tm,),
            in_specs=[
                pl.BlockSpec((tm, d_in), lambda i: (i, 0)),
                pl.BlockSpec((d_in, d_out), lambda i: (0, 0)),
                pl.BlockSpec((1, d_out), lambda i: (0, 0)),
            ],
            out_specs=pl.BlockSpec((tm, d_out), lambda i: (i, 0)),
        ),
        compiler_params=pltpu.CompilerParams(dimension_semantics=("parallel",)),
    )(x2d, w, b2)


# ---------------------------------------------------------------------------
# Fused scaled-dot-product attention kernel (per block of fused batch*head
# rows): scores -> softmax -> probs @ V, all resident in VMEM.
# ---------------------------------------------------------------------------
def _mha_kernel(q_ref, k_ref, v_ref, o_ref, *, scale):
    q = q_ref[...].astype(jnp.float32)                      # (hb, Sq, d_k)
    k = k_ref[...].astype(jnp.float32)                      # (hb, Sk, d_k)
    v = v_ref[...].astype(jnp.float32)                      # (hb, Sk, d_k)
    s = jnp.einsum("hqd,hkd->hqk", q, k,
                   preferred_element_type=jnp.float32) * scale
    m = jnp.max(s, axis=-1, keepdims=True)
    p = jnp.exp(s - m)
    denom = jnp.sum(p, axis=-1, keepdims=True)
    p = p * pl.reciprocal(denom, approx=False)              # divide on the EUP
    o = jnp.einsum("hqk,hkd->hqd", p, v,
                   preferred_element_type=jnp.float32)
    o_ref[...] = o.astype(o_ref.dtype)


def _mha_dropout_kernel(seed_ref, q_ref, k_ref, v_ref, o_ref, *, scale, p_drop):
    q = q_ref[...].astype(jnp.float32)
    k = k_ref[...].astype(jnp.float32)
    v = v_ref[...].astype(jnp.float32)
    s = jnp.einsum("hqd,hkd->hqk", q, k,
                   preferred_element_type=jnp.float32) * scale
    m = jnp.max(s, axis=-1, keepdims=True)
    p = jnp.exp(s - m)
    denom = jnp.sum(p, axis=-1, keepdims=True)
    p = p * pl.reciprocal(denom, approx=False)
    # Training-mode dropout on the attention probabilities: integer-threshold
    # compare on the raw uint32 bits (no float converts), per-block stream.
    pltpu.prng_seed(seed_ref[0] + pl.program_id(0))
    bits = pltpu.prng_random_bits(p.shape)
    thresh = jnp.uint32(min(int(p_drop * 4294967296.0), 4294967295))
    keep = bits >= thresh
    p = jnp.where(keep, p * (1.0 / (1.0 - p_drop)), 0.0)
    o = jnp.einsum("hqk,hkd->hqd", p, v,
                   preferred_element_type=jnp.float32)
    o_ref[...] = o.astype(o_ref.dtype)


def mha_attention_pallas(q, k, v, *, dropout_p=0.0, training=False, seed=0):
    bh, sq, d_k = q.shape
    _, sk, _ = k.shape
    hb = _pick_head_block(bh, sq, sk, d_k, itemsize=q.dtype.itemsize)
    scale = 1.0 / math.sqrt(d_k)
    grid = (bh // hb,)
    out_shape = jax.ShapeDtypeStruct((bh, sq, d_k), q.dtype)
    cparams = pltpu.CompilerParams(dimension_semantics=("parallel",))

    if training and dropout_p > 0.0:
        q_spec = pl.BlockSpec((hb, sq, d_k), lambda i, s_ref: (i, 0, 0))
        kv_spec = pl.BlockSpec((hb, sk, d_k), lambda i, s_ref: (i, 0, 0))
        o_spec = pl.BlockSpec((hb, sq, d_k), lambda i, s_ref: (i, 0, 0))
        seed_arr = jnp.array([seed], dtype=jnp.int32)
        return pl.pallas_call(
            functools.partial(_mha_dropout_kernel, scale=scale,
                              p_drop=float(dropout_p)),
            out_shape=out_shape,
            grid_spec=pltpu.PrefetchScalarGridSpec(
                num_scalar_prefetch=1,
                grid=grid,
                in_specs=[q_spec, kv_spec, kv_spec],
                out_specs=o_spec,
            ),
            compiler_params=cparams,
        )(seed_arr, q, k, v)

    q_spec = pl.BlockSpec((hb, sq, d_k), lambda i: (i, 0, 0))
    kv_spec = pl.BlockSpec((hb, sk, d_k), lambda i: (i, 0, 0))
    o_spec = pl.BlockSpec((hb, sq, d_k), lambda i: (i, 0, 0))
    return pl.pallas_call(
        functools.partial(_mha_kernel, scale=scale),
        out_shape=out_shape,
        grid_spec=pltpu.PrefetchScalarGridSpec(
            num_scalar_prefetch=0,
            grid=grid,
            in_specs=[q_spec, kv_spec, kv_spec],
            out_specs=o_spec,
        ),
        compiler_params=cparams,
    )(q, k, v)


# ---------------------------------------------------------------------------
# DeCov loss kernel.  For each position s: Cov_s = (1/(B-1)) c_s^T c_s with
# c_s the batch-centered context rows.  Using
#   ||Cov_s||_F^2      = (1/(B-1))^2 * sum_{a,b} (sum_j c[a,s,j] c[b,s,j])^2
#   sum_j diag(Cov)_j^2 = (1/(B-1))^2 * sum_j (sum_b c[b,s,j]^2)^2
# no DxD covariance matrix is ever materialized.  Zero-padded rows/cols
# contribute exactly zero, so sublane padding in the wrapper is free.
# ---------------------------------------------------------------------------
def _decov_kernel(x_ref, o_ref):
    nb, s1, _ = x_ref.shape
    xs = [x_ref[b].astype(jnp.float32) for b in range(nb)]   # each (s1, D)
    mean = xs[0]
    for b in range(1, nb):
        mean = mean + xs[b]
    mean = mean * (1.0 / nb)
    cs = [xb - mean for xb in xs]

    frob2 = jnp.zeros((s1, 1), jnp.float32)
    for a in range(nb):
        for b in range(nb):
            g = jnp.sum(cs[a] * cs[b], axis=-1, keepdims=True)
            frob2 = frob2 + g * g

    colsq = cs[0] * cs[0]
    for b in range(1, nb):
        colsq = colsq + cs[b] * cs[b]
    diag2 = jnp.sum(colsq * colsq, axis=-1, keepdims=True)

    coeff = 0.5 / float((nb - 1) * (nb - 1))
    o_ref[0] = coeff * jnp.sum(frob2 - diag2)


def decov_loss_pallas(ctx_sel):
    nb, s1, d = ctx_sel.shape
    s1p = ((s1 + 7) // 8) * 8
    if s1p != s1:
        ctx_sel = jnp.pad(ctx_sel, ((0, 0), (0, s1p - s1), (0, 0)))
    return pl.pallas_call(
        _decov_kernel,
        out_shape=jax.ShapeDtypeStruct((1,), jnp.float32),
        grid_spec=pltpu.PrefetchScalarGridSpec(
            num_scalar_prefetch=0,
            grid=(1,),
            in_specs=[pl.BlockSpec((nb, s1p, d), lambda i: (0, 0, 0))],
            out_specs=pl.BlockSpec(memory_space=pltpu.MemorySpace.SMEM),
        ),
        compiler_params=pltpu.CompilerParams(dimension_semantics=("arbitrary",)),
    )(ctx_sel)[0]


# ---------------------------------------------------------------------------
# MultiHeadedAttention.forward
# ---------------------------------------------------------------------------
def multi_headed_attention_forward(query, key, value,
                                   w_q, b_q, w_k, b_k, w_v, b_v, w_o, b_o,
                                   *, h, mask=None,
                                   dropout_p=0.0, training=False, seed=0):
    """query/key/value: (B, S, d_model). Weights are (in, out); y = x @ W + b."""
    # TODO(synk): attention-mask branch (mask is not None) is not implemented.
    assert mask is None
    B, S, D = query.shape
    assert D % h == 0
    d_k = D // h
    # The torch module's DeCov loop reads context positions 0 .. D inclusive.
    assert S >= D + 1, "MultiHeadedAttention DeCov loop needs seq_len >= d_model + 1"

    q2 = query.reshape(B * S, D)
    if (key is query) and (value is query):
        # Self-attention: fuse the three projections -> one HBM read of x.
        w_qkv = jnp.concatenate([w_q, w_k, w_v], axis=1)     # (D, 3D)
        b_qkv = jnp.concatenate([b_q, b_k, b_v], axis=0)     # (3D,)
        qkv = linear_pallas(q2, w_qkv, b_qkv)                # (B*S, 3D)
        qp, kp, vp = qkv[:, :D], qkv[:, D:2 * D], qkv[:, 2 * D:]
        Sk = Sv = S
    else:
        Sk, Sv = key.shape[1], value.shape[1]
        qp = linear_pallas(q2, w_q, b_q)
        kp = linear_pallas(key.reshape(B * Sk, D), w_k, b_k)
        vp = linear_pallas(value.reshape(B * Sv, D), w_v, b_v)

    def to_heads(x2p, s):
        x4 = jnp.transpose(x2p.reshape(B, s, h, d_k), (0, 2, 1, 3))
        return x4.reshape(B * h, s, d_k)

    ctx_h = mha_attention_pallas(to_heads(qp, S), to_heads(kp, Sk),
                                 to_heads(vp, Sv),
                                 dropout_p=dropout_p, training=training,
                                 seed=seed)                              # (B*h, S, d_k)
    ctx = jnp.transpose(ctx_h.reshape(B, h, S, d_k), (0, 2, 1, 3)).reshape(B, S, D)

    decov = decov_loss_pallas(ctx[:, :D + 1, :])
    out = linear_pallas(ctx.reshape(B * S, D), w_o, b_o).reshape(B, S, D)
    return out, decov


if __name__ == "__main__":
    key0 = jax.random.PRNGKey(0)
    # S must exceed d_model (DeCov loop indexes positions 0..d_model).
    B, S, D, h = 2, 136, 128, 4
    d_k = D // h
    keys = jax.random.split(key0, 9)

    x = jax.random.normal(keys[0], (B, S, D), dtype=jnp.float32)
    sw = 1.0 / math.sqrt(D)
    w_q = jax.random.normal(keys[1], (D, D), jnp.float32) * sw
    w_k = jax.random.normal(keys[2], (D, D), jnp.float32) * sw
    w_v = jax.random.normal(keys[3], (D, D), jnp.float32) * sw
    w_o = jax.random.normal(keys[4], (D, D), jnp.float32) * sw
    b_q = jax.random.normal(keys[5], (D,), jnp.float32) * 0.1
    b_k = jax.random.normal(keys[6], (D,), jnp.float32) * 0.1
    b_v = jax.random.normal(keys[7], (D,), jnp.float32) * 0.1
    b_o = jax.random.normal(keys[8], (D,), jnp.float32) * 0.1

    out, decov = multi_headed_attention_forward(
        x, x, x, w_q, b_q, w_k, b_k, w_v, b_v, w_o, b_o,
        h=h, mask=None, dropout_p=0.0, training=False)
    jax.block_until_ready(out)
    jax.block_until_ready(decov)

    # ---------------- pure-JAX reference (mirrors the torch module) ----------
    hp = jax.lax.Precision.HIGHEST

    def lin(xx, w, b):
        return jnp.dot(xx, w, precision=hp) + b

    def split_heads(xx):
        return jnp.transpose(xx.reshape(B, S, h, d_k), (0, 2, 1, 3))

    qh = split_heads(lin(x.reshape(B * S, D), w_q, b_q))
    kh = split_heads(lin(x.reshape(B * S, D), w_k, b_k))
    vh = split_heads(lin(x.reshape(B * S, D), w_v, b_v))
    scores = jnp.einsum("bhqd,bhkd->bhqk", qh, kh, precision=hp) / math.sqrt(d_k)
    p_attn = jax.nn.softmax(scores, axis=-1)
    ctx_ref = jnp.einsum("bhqk,bhkd->bhqd", p_attn, vh, precision=hp)
    ctx_ref = jnp.transpose(ctx_ref, (0, 2, 1, 3)).reshape(B, S, D)

    m = jnp.transpose(ctx_ref[:, :D + 1, :], (1, 2, 0))          # (D+1, D, B)
    c = m - jnp.mean(m, axis=2, keepdims=True)
    covs = jnp.einsum("sib,sjb->sij", c, c, precision=hp) / (B - 1)
    fro2 = jnp.sum(covs * covs, axis=(1, 2))
    dg2 = jnp.sum(jnp.square(jnp.diagonal(covs, axis1=1, axis2=2)), axis=1)
    decov_ref = 0.5 * jnp.sum(fro2 - dg2)
    out_ref = lin(ctx_ref.reshape(B * S, D), w_o, b_o).reshape(B, S, D)

    assert out.shape == (B, S, D)
    assert jnp.allclose(out, out_ref, atol=1e-2, rtol=1e-2), \
        float(jnp.max(jnp.abs(out - out_ref)))
    rel = abs(float(decov) - float(decov_ref)) / (abs(float(decov_ref)) + 1e-6)
    assert rel < 1e-2, (float(decov), float(decov_ref))

    print("KERNEL_OK")
</pallas_src>

<mosaic_0001>
module attributes {stable_mosaic.version = 11 : i64} {
  func.func @_linear_kernel(%arg0: i32, %arg1: memref<272x128xf32, #tpu.memory_space<vmem>>, %arg2: memref<128x384xf32, #tpu.memory_space<vmem>>, %arg3: memref<1x384xf32, #tpu.memory_space<vmem>>, %arg4: memref<272x384xf32, #tpu.memory_space<vmem>>) attributes {dimension_semantics = [#tpu.dimension_semantics<parallel>], iteration_bounds = array<i64: 1>, scalar_prefetch = 0 : i64, scratch_operands = 0 : i64, tpu.core_type = #tpu.core_type<tc>, window_params = [{transform_indices = @transform_0, window_bounds = array<i64: 272, 128>}, {pipeline_mode = #tpu.pipeline_mode<synchronous>, transform_indices = @transform_1, window_bounds = array<i64: 128, 384>}, {pipeline_mode = #tpu.pipeline_mode<synchronous>, transform_indices = @transform_2, window_bounds = array<i64: 1, 384>}, {transform_indices = @transform_3, window_bounds = array<i64: 272, 384>}]} {
    %c0 = arith.constant 0 : index
    %c0_0 = arith.constant 0 : index
    %0 = vector.load %arg1[%c0, %c0_0] : memref<272x128xf32, #tpu.memory_space<vmem>>, vector<272x128xf32>
    %c0_1 = arith.constant 0 : index
    %c0_2 = arith.constant 0 : index
    %1 = vector.load %arg2[%c0_1, %c0_2] : memref<128x384xf32, #tpu.memory_space<vmem>>, vector<128x384xf32>
    %cst = arith.constant dense<0.000000e+00> : vector<272x384xf32>
    %2 = tpu.matmul %0, %1, %cst {dimension_numbers = #tpu.dot_dimension_numbers<[1], [0], [0], [1], [0, 0, 1, 1], [], []>} : vector<272x128xf32>, vector<128x384xf32>, vector<272x384xf32> -> vector<272x384xf32>
    %c0_3 = arith.constant 0 : index
    %c0_4 = arith.constant 0 : index
    %3 = vector.load %arg3[%c0_3, %c0_4] : memref<1x384xf32, #tpu.memory_space<vmem>>, vector<1x384xf32>
    %4 = vector.broadcast %3 : vector<1x384xf32> to vector<272x384xf32>
    %5 = arith.addf %2, %4 : vector<272x384xf32>
    %c0_5 = arith.constant 0 : index
    %c0_6 = arith.constant 0 : index
    %6 = vector.load %arg4[%c0_5, %c0_6] : memref<272x384xf32, #tpu.memory_space<vmem>>, vector<272x384xf32>
    tpu.vector_store %arg4[%c0_5, %c0_6], %5 {strides = array<i32>} : memref<272x384xf32, #tpu.memory_space<vmem>>, vector<272x384xf32>,
    return
  }
  func.func @transform_0(%arg0: i32) -> (i32, i32) {
    %c0_i32 = arith.constant 0 : i32
    %c0_i32_0 = arith.constant 0 : i32
    return %arg0, %c0_i32 : i32, i32
  }
  func.func @transform_1(%arg0: i32) -> (i32, i32) {
    %c0_i32 = arith.constant 0 : i32
    %c0_i32_0 = arith.constant 0 : i32
    %c0_i32_1 = arith.constant 0 : i32
    return %c0_i32, %c0_i32_0 : i32, i32
  }
  func.func @transform_2(%arg0: i32) -> (i32, i32) {
    %c0_i32 = arith.constant 0 : i32
    %c0_i32_0 = arith.constant 0 : i32
    %c0_i32_1 = arith.constant 0 : i32
    return %c0_i32, %c0_i32_0 : i32, i32
  }
  func.func @transform_3(%arg0: i32) -> (i32, i32) {
    %c0_i32 = arith.constant 0 : i32
    %c0_i32_0 = arith.constant 0 : i32
    return %arg0, %c0_i32 : i32, i32
  }
}

</mosaic_0001>

<bundles_post_ra>
// kernel: tpu_custom_call.1
= control target key start
LH: loop header
LB: loop body
LE: loop exit
PB: predicated region body
PF: predicated region fallthrough
CT: control target
= control target key end

     0   :  { %8 = vsyncpa [#allocation3], 0  ;;  %s1328_s0 = inlined_call_operand.hbm [shape: f32[272,128], index: 0, kind: input, shape index: {}]   ;;  %s1329_s1 = inlined_call_operand.hbm [shape: f32[128,384], index: 1, kind: input, shape index: {}]   ;;  %s1330_s2 = inlined_call_operand.vmem [shape: f32[1,384], index: 2, kind: input, shape index: {}]   ;;  %s1331_s3 = inlined_call_operand.hbm [shape: f32[272,384], index: 3, kind: output, shape index: {}]  }
   0x1   :  { %9 = vsyncpa [#allocation6], 0 }
   0x2   :  { %10 = vsyncpa [#allocation4], 0  ;;  %s1059_s12 = smov [#allocation2]   ;;  %s987_s16 = scalar_lea.hbm %s1328_s0, 4352 }
   0x3   :  { %s16_s13 = sshll.u32 %s1059_s12, 4  ;;  %p988_p0 = scmp.ne.s32.totalorder %s1328_s0, %s987_s16  ;;  %s17_s13 = int_to_ptr.vmem [resolvable:$true] %s16_s13 }
   0x4   :  { %p991_p1 = scmp.lt.u32.totalorder %s987_s16, %s1328_s0 }
   0x6   :  { %p993_p2 = pnand %p991_p1, %p988_p0 }
   0x8   :  { %996 = shalt.err (!%p993_p2)
}
   0x9   :  { %s997_s21 = scalar_lea.vmem %s17_s13, 4352  ;;  %p1002_p4 = scmp.lt.s32.totalorder %s17_s13, %s17_s13 }
   0xa   :  { %p998_p3 = scmp.ne.s32.totalorder %s17_s13, %s997_s21  ;;  %p1003_p5 = scmp.lt.s32.totalorder %s997_s21, %s997_s21 }
   0xc   :  { %p1004_p6 = por %p1003_p5, %p1002_p4 }
   0xe   :  { %p1005_p7 = pnand %p1004_p6, %p998_p3 }
  0x10   :  { %1008 = shalt.err (!%p1005_p7)
}
  0x11   :  { %s1060_s22 = smov 128   ;;  %s1061_s23 = smov 8  }
  0x12   :  { %22 = dma.hbm_to_vmem [thread:$0]  %s1328_s0, 4352, %s17_s13, [#allocation3], %s1060_s22, %s1060_s22, %s1061_s23  }
  0x13   :  { %s1062_s26 = smov [#allocation5]   ;;  %s1009_s30 = scalar_lea.hbm %s1329_s1, 6144 }
  0x14   :  { %s28_s27 = sshll.u32 %s1062_s26, 4  ;;  %p1010_p8 = scmp.ne.s32.totalorder %s1329_s1, %s1009_s30  ;;  %s29_s27 = int_to_ptr.vmem [resolvable:$true] %s28_s27 }
  0x15   :  { %p1013_p9 = scmp.lt.u32.totalorder %s1009_s30, %s1329_s1 }
  0x17   :  { %p1015_p10 = pnand %p1013_p9, %p1010_p8 }
  0x19   :  { %1018 = shalt.err (!%p1015_p10)
}
  0x1a   :  { %s1019_s8 = scalar_lea.vmem %s29_s27, 6144  ;;  %p1024_p12 = scmp.lt.s32.totalorder %s29_s27, %s29_s27 }
  0x1b   :  { %p1020_p11 = scmp.ne.s32.totalorder %s29_s27, %s1019_s8  ;;  %p1025_p13 = scmp.lt.s32.totalorder %s1019_s8, %s1019_s8 }
  0x1d   :  { %p1026_p0 = por %p1025_p13, %p1024_p12 }
  0x1f   :  { %p1027_p1 = pnand %p1026_p0, %p1020_p11 }
  0x21   :  { %1030 = shalt.err (!%p1027_p1)
}
  0x22   :  { %s1063_s0 = smov 384   ;;  %s1064_s9 = smov 24  }
  0x23   :  { %34 = dma.hbm_to_vmem [thread:$0]  %s1329_s1, 6144, %s29_s27, [#allocation6], %s1063_s0, %s1063_s0, %s1064_s9  }
  0x24   :  { %1053 = dma.done.wait [#allocation3], 4352  }
  0x25   :  { %1054 = vsyncadd [#allocation3], 4294962944 }
  0x26   :  { %1055 = dma.done.wait [#allocation6], 6144  }
  0x27   :  { %1056 = vsyncadd [#allocation6], 4294961152  ;;  %v1065_v0 = vmov 0.0   ;;  %v78_v1 = vld [vmem:[#allocation5 + $0x8] sm:$0xff]  ;;  %v81_v2 = vld [vmem:[#allocation5 + $0x20] sm:$0xff] }
  0x28   :  { %206 = vmatprep.mubr.f32.mxu0 %v1065_v0  ;;  %362 = vmatprep.mubr.f32.mxu1 %v1065_v0  ;;  %v77_v3 = vld [vmem:[#allocation5] sm:$0xff]  ;;  %v899_v4 = vpack.c.bf16 %v81_v2, %v78_v1  ;;  %v80_v5 = vld [vmem:[#allocation5 + $0x18] sm:$0xff]  ;;  %v87_v7 = vld [vmem:[#allocation5 + $0x50] sm:$0xff] }
  0x29   :  { %v84_v6 = vld [vmem:[#allocation5 + $0x38] sm:$0xff]  ;;  %v901_v8 = vpack.c.bf16 %v80_v5, %v77_v3  ;;  %v83_v10 = vld [vmem:[#allocation5 + $0x30] sm:$0xff]  ;;  %v86_v11 = vld [vmem:[#allocation5 + $0x48] sm:$0xff] }
  0x2a   :  { %v903_v9 = vpack.c.bf16 %v87_v7, %v84_v6  ;;  %v90_v12 = vld [vmem:[#allocation5 + $0x68] sm:$0xff]  ;;  %900 = vmatprep.subr.bf16.mxu0 %v899_v4  ;;  %963 = vmatprep.subr.bf16.mxu1 %v899_v4  ;;  %v93_v13 = vld [vmem:[#allocation5 + $0x80] sm:$0xff]  ;;  %v905_v14 = vpack.c.bf16 %v86_v11, %v83_v10  ;;  %v92_v17 = vld [vmem:[#allocation5 + $0x78] sm:$0xff] }
  0x2b   :  { %902 = vmatpush1.bf16.msra.mxu0 %v901_v8  ;;  %971 = vmatpush1.bf16.msra.mxu1 %v901_v8  ;;  %v907_v15 = vpack.c.bf16 %v93_v13, %v90_v12  ;;  %v89_v16 = vld [vmem:[#allocation5 + $0x60] sm:$0xff]  ;;  %v96_v18 = vld [vmem:[#allocation5 + $0x98] sm:$0xff]  ;;  %v99_v19 = vld [vmem:[#allocation5 + $0xb0] sm:$0xff] }
  0x2c   :  { %904 = vmatprep.subr.bf16.mxu0 %v903_v9  ;;  %964 = vmatprep.subr.bf16.mxu1 %v903_v9  ;;  %v909_v20 = vpack.c.bf16 %v92_v17, %v89_v16  ;;  %v911_v21 = vpack.c.bf16 %v99_v19, %v96_v18  ;;  %v95_v22 = vld [vmem:[#allocation5 + $0x90] sm:$0xff]  ;;  %v98_v23 = vld [vmem:[#allocation5 + $0xa8] sm:$0xff]  ;;  %v105_v25 = vld [vmem:[#allocation5 + $0xe0] sm:$0xff] }
  0x2d   :  { %v102_v24 = vld [vmem:[#allocation5 + $0xc8] sm:$0xff]  ;;  %v913_v26 = vpack.c.bf16 %v98_v23, %v95_v22  ;;  %v101_v28 = vld [vmem:[#allocation5 + $0xc0] sm:$0xff]  ;;  %v104_v29 = vld [vmem:[#allocation5 + $0xd8] sm:$0xff] }
  0x2e   :  { %v915_v27 = vpack.c.bf16 %v105_v25, %v102_v24  ;;  %v108_v30 = vld [vmem:[#allocation5 + $0xf8] sm:$0xff]  ;;  %v111_v31 = vld [vmem:[#allocation5 + $0x110] sm:$0xff]  ;;  %v917_v32 = vpack.c.bf16 %v104_v29, %v101_v28  ;;  %v110_v35 = vld [vmem:[#allocation5 + $0x108] sm:$0xff] }
  0x2f   :  { %906 = vmatpush1.bf16.msra.mxu0 %v905_v14  ;;  %972 = vmatpush1.bf16.msra.mxu1 %v905_v14  ;;  %v919_v33 = vpack.c.bf16 %v111_v31, %v108_v30  ;;  %v107_v34 = vld [vmem:[#allocation5 + $0xf0] sm:$0xff]  ;;  %v114_v36 = vld [vmem:[#allocation5 + $0x128] sm:$0xff]  ;;  %v117_v37 = vld [vmem:[#allocation5 + $0x140] sm:$0xff] }
  0x30   :  { %908 = vmatprep.subr.bf16.mxu0 %v907_v15  ;;  %965 = vmatprep.subr.bf16.mxu1 %v907_v15  ;;  %v921_v38 = vpack.c.bf16 %v110_v35, %v107_v34  ;;  %v923_v39 = vpack.c.bf16 %v117_v37, %v114_v36  ;;  %v113_v40 = vld [vmem:[#allocation5 + $0x120] sm:$0xff]  ;;  %v116_v41 = vld [vmem:[#allocation5 + $0x138] sm:$0xff]  ;;  %v123_v43 = vld [vmem:[#allocation5 + $0x170] sm:$0xff] }
  0x31   :  { %v120_v42 = vld [vmem:[#allocation5 + $0x158] sm:$0xff]  ;;  %v925_v44 = vpack.c.bf16 %v116_v41, %v113_v40  ;;  %v119_v46 = vld [vmem:[#allocation5 + $0x150] sm:$0xff]  ;;  %v122_v47 = vld [vmem:[#allocation5 + $0x168] sm:$0xff] }
  0x32   :  { %v927_v45 = vpack.c.bf16 %v123_v43, %v120_v42  ;;  %v79_v48 = vld [vmem:[#allocation5 + $0x10] sm:$0xff]  ;;  %v82_v49 = vld [vmem:[#allocation5 + $0x28] sm:$0xff]  ;;  %v929_v50 = vpack.c.bf16 %v122_v47, %v119_v46  ;;  %v85_v52 = vld [vmem:[#allocation5 + $0x40] sm:$0xff] }
  0x33   :  { %910 = vmatpush1.bf16.msra.mxu0 %v909_v20  ;;  %973 = vmatpush1.bf16.msra.mxu1 %v909_v20  ;;  %v931_v51 = vpack.c.bf16 %v82_v49, %v79_v48  ;;  %v88_v53 = vld [vmem:[#allocation5 + $0x58] sm:$0xff]  ;;  %v1116_v54 = vld [vmem:[#allocation2] sm:$0xff]  ;;  %v1118_v55 = vld [vmem:[#allocation2 + $0xd0] sm:$0xff] }
  0x34   :  { %912 = vmatprep.subr.bf16.mxu0 %v911_v21  ;;  %966 = vmatprep.subr.bf16.mxu1 %v911_v21  ;;  %v935_v56 = vpack.c.bf16 %v88_v53, %v85_v52  ;;  %v91_v57 = vld [vmem:[#allocation5 + $0x70] sm:$0xff]  ;;  %v94_v58 = vld [vmem:[#allocation5 + $0x88] sm:$0xff]  ;;  %v1123_v59 = vld [vmem:[#allocation2 + $0x8] sm:$0xff] }
  0x35   :  { %v1125_v60 = vld [vmem:[#allocation2 + $0xd8] sm:$0xff]  ;;  %v939_v61 = vpack.c.bf16 %v94_v58, %v91_v57  ;;  %v97_v62 = vld [vmem:[#allocation5 + $0xa0] sm:$0xff]  ;;  %v100_v63 = vld [vmem:[#allocation5 + $0xb8] sm:$0xff] }
  0x36   :  { %v1131_v1 = vld [vmem:[#allocation2 + $0x10] sm:$0xff]  ;;  %v1133_v2 = vld [vmem:[#allocation2 + $0xe0] sm:$0xff]  ;;  %v943_v3 = vpack.c.bf16 %v100_v63, %v97_v62  ;;  %v106_v5 = vld [vmem:[#allocation5 + $0xe8] sm:$0xff] }
  0x37   :  { %914 = vmatpush1.bf16.msra.mxu0 %v913_v26  ;;  %974 = vmatpush1.bf16.msra.mxu1 %v913_v26  ;;  %v103_v4 = vld [vmem:[#allocation5 + $0xd0] sm:$0xff]  ;;  %v46_v6 = vld [vmem:[#allocation2 + $0x18] sm:$0xff]  ;;  %v1139_v7 = vld [vmem:[#allocation2 + $0xe8] sm:$0xff] }
  0x38   :  { %916 = vmatprep.subr.bf16.mxu0 %v915_v27  ;;  %967 = vmatprep.subr.bf16.mxu1 %v915_v27  ;;  %v947_v8 = vpack.c.bf16 %v106_v5, %v103_v4  ;;  %v109_v9 = vld [vmem:[#allocation5 + $0x100] sm:$0xff]  ;;  %v112_v10 = vld [vmem:[#allocation5 + $0x118] sm:$0xff]  ;;  %v47_v11 = vld [vmem:[#allocation2 + $0x20] sm:$0xff] }
  0x39   :  { %v1144_v12 = vld [vmem:[#allocation2 + $0xf0] sm:$0xff]  ;;  %v951_v13 = vpack.c.bf16 %v112_v10, %v109_v9  ;;  %v115_v14 = vld [vmem:[#allocation5 + $0x130] sm:$0xff]  ;;  %v118_v15 = vld [vmem:[#allocation5 + $0x148] sm:$0xff] }
  0x3a   :  { %v48_v16 = vld [vmem:[#allocation2 + $0x28] sm:$0xff]  ;;  %v1149_v17 = vld [vmem:[#allocation2 + $0xf8] sm:$0xff]  ;;  %v955_v18 = vpack.c.bf16 %v118_v15, %v115_v14  ;;  %v121_v19 = vld [vmem:[#allocation5 + $0x160] sm:$0xff] }
  0x3b   :  { %918 = vmatpush1.bf16.msra.mxu0 %v917_v32  ;;  %975 = vmatpush1.bf16.msra.mxu1 %v917_v32  ;;  %v124_v20 = vld [vmem:[#allocation5 + $0x178] sm:$0xff]  ;;  %v49_v21 = vld [vmem:[#allocation2 + $0x30] sm:$0xff]  ;;  %v1154_v22 = vld [vmem:[#allocation2 + $0x100] sm:$0xff] }
  0x3c   :  { %920 = vmatprep.subr.bf16.mxu0 %v919_v33  ;;  %968 = vmatprep.subr.bf16.mxu1 %v919_v33  ;;  %v959_v23 = vpack.c.bf16 %v124_v20, %v121_v19  ;;  %v50_v24 = vld [vmem:[#allocation2 + $0x38] sm:$0xff]  ;;  %v1159_v25 = vld [vmem:[#allocation2 + $0x108] sm:$0xff]  ;;  %v51_v26 = vld [vmem:[#allocation2 + $0x40] sm:$0xff] }
  0x3d   :  { %v52_v27 = vld [vmem:[#allocation2 + $0x48] sm:$0xff]  ;;  %v53_v28 = vld [vmem:[#allocation2 + $0x50] sm:$0xff]  ;;  %v54_v29 = vld [vmem:[#allocation2 + $0x58] sm:$0xff] }
  0x3e   :  { %v55_v30 = vld [vmem:[#allocation2 + $0x60] sm:$0xff]  ;;  %v56_v31 = vld [vmem:[#allocation2 + $0x68] sm:$0xff]  ;;  %v57_v32 = vld [vmem:[#allocation2 + $0x70] sm:$0xff] }
  0x3f   :  { %922 = vmatpush1.bf16.msra.mxu0 %v921_v38  ;;  %976 = vmatpush1.bf16.msra.mxu1 %v921_v38  ;;  %v58_v33 = vld [vmem:[#allocation2 + $0x78] sm:$0xff]  ;;  %v59_v34 = vld [vmem:[#allocation2 + $0x80] sm:$0xff]  ;;  %v60_v35 = vld [vmem:[#allocation2 + $0x88] sm:$0xff] }
  0x40   :  { %924 = vmatprep.subr.bf16.mxu0 %v923_v39  ;;  %969 = vmatprep.subr.bf16.mxu1 %v923_v39  ;;  %v61_v36 = vld [vmem:[#allocation2 + $0x90] sm:$0xff]  ;;  %v62_v37 = vld [vmem:[#allocation2 + $0x98] sm:$0xff]  ;;  %v63_v38 = vld [vmem:[#allocation2 + $0xa0] sm:$0xff] }
  0x41   :  { %v64_v39 = vld [vmem:[#allocation2 + $0xa8] sm:$0xff]  ;;  %v65_v40 = vld [vmem:[#allocation2 + $0xb0] sm:$0xff]  ;;  %v66_v41 = vld [vmem:[#allocation2 + $0xb8] sm:$0xff] }
  0x42   :  { %v67_v42 = vld [vmem:[#allocation2 + $0xc0] sm:$0xff]  ;;  %v68_v43 = vld [vmem:[#allocation2 + $0xc8] sm:$0xff] }
  0x43   :  { %926 = vmatpush1.bf16.msra.mxu0 %v925_v44  ;;  %977 = vmatpush1.bf16.msra.mxu1 %v925_v44  ;;  %v127_v44 = vlaneseq  ;;  %v1198_v47 = vld [vmem:[%s1330_s2] sm:$0x7]  ;;  %s1066_s2 = smov [#allocation7]  }
  0x44   :  { %928 = vmatprep.subr.bf16.mxu0 %v927_v45  ;;  %970 = vmatprep.subr.bf16.mxu1 %v927_v45  ;;  %s753_s13 = sshll.u32 %s1066_s2, 4  ;;  %s754_s13 = int_to_ptr.vmem [resolvable:$true] %s753_s13 }
  0x45   :  { %v1192_v45 = vshrl.u32 %v127_v44, 7  ;;  %s1031_s14 = scalar_lea.vmem %s754_s13, 13056  ;;  %p1036_p3 = scmp.lt.s32.totalorder %s754_s13, %s754_s13 }
  0x46   :  { %p1032_p2 = scmp.ne.s32.totalorder %s754_s13, %s1031_s14  ;;  %p1037_p4 = scmp.lt.s32.totalorder %s1031_s14, %s1031_s14 }
  0x47   :  { %930 = vmatpush1.bf16.msra.mxu0 %v929_v50  ;;  %978 = vmatpush1.bf16.msra.mxu1 %v929_v50  ;;  %v129_v46 = vsub.s32 0, %v1192_v45  ;;  %v133_v48 = vsub.s32 1, %v1192_v45 }
  0x48   :  { %932 = vmatprep.subr.bf16.mxu1 %v931_v51  ;;  %p1038_p5 = por %p1037_p4, %p1036_p3 }
  0x49   :  { %v1202_v49 = vrot.slane %v1198_v47, %v129_v46  ;;  %v1205_v50 = vrot.slane %v1198_v47, %v133_v48 }
  0x4a   :  { %207 = vmatmul.mubr.f32.vlgmr.msra.gmra.mrb[0].mxu0 %v1116_v54  ;;  %363 = vmatmul.mubr.f32.vlgmr.msra.gmra.mrb[0].mxu1 %v1118_v55  ;;  %p1039_p6 = pnand %p1038_p5, %p1032_p2 }
  0x4b   :  { %212 = vmatprep.mubr.f32.mxu0 %v1065_v0  ;;  %934 = vmatpush3.bf16.msra.mxu1 %v931_v51 }
  0x4c   :  { %368 = vmatprep.mubr.f32.mxu1 %v1065_v0  ;;  %936 = vmatprep.subr.bf16.mxu1 %v935_v56 }
  0x4e   :  { %213 = vmatmul.mubr.f32.gmra.mrb[2].mxu0 %v1123_v59  ;;  %369 = vmatmul.mubr.f32.gmra.mrb[2].mxu1 %v1125_v60 }
  0x4f   :  { %218 = vmatprep.mubr.f32.mxu0 %v1065_v0  ;;  %938 = vmatpush3.bf16.msra.mxu1 %v935_v56 }
  0x50   :  { %374 = vmatprep.mubr.f32.mxu1 %v1065_v0  ;;  %940 = vmatprep.subr.bf16.mxu1 %v939_v61 }
  0x52   :  { %219 = vmatmul.mubr.f32.gmra.mrb[4].mxu0 %v1131_v1  ;;  %375 = vmatmul.mubr.f32.gmra.mrb[4].mxu1 %v1133_v2 }
  0x53   :  { %224 = vmatprep.mubr.f32.mxu0 %v1065_v0  ;;  %942 = vmatpush3.bf16.msra.mxu1 %v939_v61 }
  0x54   :  { %380 = vmatprep.mubr.f32.mxu1 %v1065_v0  ;;  %944 = vmatprep.subr.bf16.mxu1 %v943_v3 }
  0x56   :  { %225 = vmatmul.mubr.f32.gmra.mrb[6].mxu0 %v46_v6  ;;  %381 = vmatmul.mubr.f32.gmra.mrb[6].mxu1 %v1139_v7 }
  0x57   :  { %230 = vmatprep.mubr.f32.mxu0 %v1065_v0  ;;  %946 = vmatpush3.bf16.msra.mxu1 %v943_v3 }
  0x58   :  { %386 = vmatprep.mubr.f32.mxu1 %v1065_v0  ;;  %948 = vmatprep.subr.bf16.mxu1 %v947_v8 }
  0x5a   :  { %231 = vmatmul.mubr.f32.gmra.mrb[8].mxu0 %v47_v11  ;;  %387 = vmatmul.mubr.f32.gmra.mrb[8].mxu1 %v1144_v12 }
  0x5b   :  { %236 = vmatprep.mubr.f32.mxu0 %v1065_v0  ;;  %950 = vmatpush3.bf16.msra.mxu1 %v947_v8 }
  0x5c   :  { %392 = vmatprep.mubr.f32.mxu1 %v1065_v0  ;;  %952 = vmatprep.subr.bf16.mxu1 %v951_v13 }
  0x5e   :  { %237 = vmatmul.mubr.f32.gmra.mrb[10].mxu0 %v48_v16  ;;  %393 = vmatmul.mubr.f32.gmra.mrb[10].mxu1 %v1149_v17 }
  0x5f   :  { %242 = vmatprep.mubr.f32.mxu0 %v1065_v0  ;;  %954 = vmatpush3.bf16.msra.mxu1 %v951_v13 }
  0x60   :  { %398 = vmatprep.mubr.f32.mxu1 %v1065_v0  ;;  %956 = vmatprep.subr.bf16.mxu1 %v955_v18 }
  0x62   :  { %243 = vmatmul.mubr.f32.gmra.mrb[12].mxu0 %v49_v21  ;;  %399 = vmatmul.mubr.f32.gmra.mrb[12].mxu1 %v1154_v22 }
  0x63   :  { %248 = vmatprep.mubr.f32.mxu0 %v1065_v0  ;;  %958 = vmatpush3.bf16.msra.mxu1 %v955_v18 }
  0x64   :  { %404 = vmatprep.mubr.f32.mxu1 %v1065_v0  ;;  %960 = vmatprep.subr.bf16.mxu1 %v959_v23 }
  0x66   :  { %249 = vmatmul.mubr.f32.gmra.mrb[14].mxu0 %v50_v24  ;;  %405 = vmatmul.mubr.f32.gmra.mrb[14].mxu1 %v1159_v25 }
  0x67   :  { %254 = vmatprep.mubr.f32.mxu0 %v1065_v0  ;;  %962 = vmatpush3.bf16.msra.mxu1 %v959_v23 }
  0x68   :  { %848 = vmatprep.mubr.f32.mxu1 %v1116_v54 }
  0x6a   :  { %255 = vmatmul.mubr.f32.gmra.mrb[16].mxu0 %v51_v26  ;;  %849 = vmatmul.mubr.f32.vlgmr.msra.gmra.mrb[16].mxu1 %v1123_v59 }
  0x6b   :  { %260 = vmatprep.mubr.f32.mxu0 %v1065_v0  ;;  %851 = vmatprep.mubr.f32.mxu1 %v1131_v1 }
  0x6e   :  { %261 = vmatmul.mubr.f32.gmra.mrb[18].mxu0 %v52_v27  ;;  %852 = vmatmul.mubr.f32.gmra.mrb[18].mxu1 %v46_v6 }
  0x6f   :  { %266 = vmatprep.mubr.f32.mxu0 %v1065_v0  ;;  %854 = vmatprep.mubr.f32.mxu1 %v47_v11 }
  0x72   :  { %267 = vmatmul.mubr.f32.gmra.mrb[20].mxu0 %v53_v28  ;;  %855 = vmatmul.mubr.f32.gmra.mrb[20].mxu1 %v48_v16 }
  0x73   :  { %272 = vmatprep.mubr.f32.mxu0 %v1065_v0  ;;  %857 = vmatprep.mubr.f32.mxu1 %v49_v21 }
  0x76   :  { %273 = vmatmul.mubr.f32.gmra.mrb[22].mxu0 %v54_v29  ;;  %858 = vmatmul.mubr.f32.gmra.mrb[22].mxu1 %v50_v24 }
  0x77   :  { %278 = vmatprep.mubr.f32.mxu0 %v1065_v0  ;;  %860 = vmatprep.mubr.f32.mxu1 %v51_v26 }
  0x7a   :  { %279 = vmatmul.mubr.f32.gmra.mrb[24].mxu0 %v55_v30  ;;  %861 = vmatmul.mubr.f32.gmra.mrb[24].mxu1 %v52_v27 }
  0x7b   :  { %284 = vmatprep.mubr.f32.mxu0 %v1065_v0  ;;  %863 = vmatprep.mubr.f32.mxu1 %v53_v28 }
  0x7e   :  { %285 = vmatmul.mubr.f32.gmra.mrb[26].mxu0 %v56_v31  ;;  %864 = vmatmul.mubr.f32.gmra.mrb[26].mxu1 %v54_v29 }
  0x7f   :  { %290 = vmatprep.mubr.f32.mxu0 %v1065_v0  ;;  %866 = vmatprep.mubr.f32.mxu1 %v55_v30 }
  0x82   :  { %291 = vmatmul.mubr.f32.gmra.mrb[28].mxu0 %v57_v32  ;;  %867 = vmatmul.mubr.f32.gmra.mrb[28].mxu1 %v56_v31 }
  0x83   :  { %296 = vmatprep.mubr.f32.mxu0 %v1065_v0  ;;  %869 = vmatprep.mubr.f32.mxu1 %v57_v32 }
  0x86   :  { %297 = vmatmul.mubr.f32.gmra.mrb[30].mxu0 %v58_v33  ;;  %870 = vmatmul.mubr.f32.gmra.mrb[30].mxu1 %v58_v33 }
  0x87   :  { %302 = vmatprep.mubr.f32.mxu0 %v1065_v0  ;;  %872 = vmatprep.mubr.f32.mxu1 %v59_v34 }
  0x8a   :  { %303 = vmatmul.mubr.f32.gmra.mrb[32].mxu0 %v59_v34  ;;  %873 = vmatmul.mubr.f32.gmra.mrb[32].mxu1 %v60_v35 }
  0x8b   :  { %308 = vmatprep.mubr.f32.mxu0 %v1065_v0  ;;  %875 = vmatprep.mubr.f32.mxu1 %v61_v36 }
  0x8e   :  { %309 = vmatmul.mubr.f32.gmra.mrb[34].mxu0 %v60_v35  ;;  %876 = vmatmul.mubr.f32.gmra.mrb[34].mxu1 %v62_v37 }
  0x8f   :  { %314 = vmatprep.mubr.f32.mxu0 %v1065_v0  ;;  %878 = vmatprep.mubr.f32.mxu1 %v63_v38 }
  0x92   :  { %315 = vmatmul.mubr.f32.gmra.mrb[36].mxu0 %v61_v36  ;;  %879 = vmatmul.mubr.f32.gmra.mrb[36].mxu1 %v64_v39 }
  0x93   :  { %320 = vmatprep.mubr.f32.mxu0 %v1065_v0  ;;  %881 = vmatprep.mubr.f32.mxu1 %v65_v40 }
  0x96   :  { %321 = vmatmul.mubr.f32.gmra.mrb[38].mxu0 %v62_v37  ;;  %882 = vmatmul.mubr.f32.gmra.mrb[38].mxu1 %v66_v41 }
  0x97   :  { %326 = vmatprep.mubr.f32.mxu0 %v1065_v0  ;;  %884 = vmatprep.mubr.f32.mxu1 %v67_v42 }
  0x9a   :  { %327 = vmatmul.mubr.f32.gmra.mrb[40].mxu0 %v63_v38  ;;  %885 = vmatmul.mubr.f32.gmra.mrb[40].mxu1 %v68_v43 }
  0x9b   :  { %332 = vmatprep.mubr.f32.mxu0 %v1065_v0  ;;  %887 = vmatprep.mubr.f32.mxu1 %v1118_v55 }
  0x9e   :  { %333 = vmatmul.mubr.f32.gmra.mrb[42].mxu0 %v64_v39  ;;  %888 = vmatmul.mubr.f32.gmra.mrb[42].mxu1 %v1125_v60 }
  0x9f   :  { %338 = vmatprep.mubr.f32.mxu0 %v1065_v0  ;;  %890 = vmatprep.mubr.f32.mxu1 %v1133_v2 }
  0xa2   :  { %339 = vmatmul.mubr.f32.gmra.mrb[44].mxu0 %v65_v40  ;;  %891 = vmatmul.mubr.f32.gmra.mrb[44].mxu1 %v1139_v7 }
  0xa3   :  { %344 = vmatprep.mubr.f32.mxu0 %v1065_v0  ;;  %893 = vmatprep.mubr.f32.mxu1 %v1144_v12 }
  0xa6   :  { %345 = vmatmul.mubr.f32.gmra.mrb[46].mxu0 %v66_v41  ;;  %894 = vmatmul.mubr.f32.gmra.mrb[46].mxu1 %v1149_v17  ;;  %v137_v41 = vsub.s32 2, %v1192_v45 }
  0xa7   :  { %350 = vmatprep.mubr.f32.mxu0 %v1065_v0  ;;  %896 = vmatprep.mubr.f32.mxu1 %v1154_v22 }
  0xaa   :  { %351 = vmatmul.mubr.f32.gmra.mrb[48].mxu0 %v67_v42  ;;  %897 = vmatmul.mubr.f32.gmra.mrb[48].mxu1 %v1159_v25 }
  0xab   :  { %356 = vmatprep.mubr.f32.mxu0 %v1065_v0 }
  0xae   :  { %357 = vmatmul.mubr.f32.gmra.mrb[50].mxu0 %v68_v43 }
 0x11d   :  { %v208_v0 = vpop.f32.mrb[0].mxu0  ;;  %v364_v51 = vpop.f32.mrb[0].mxu1 }
 0x11e   :  { %v209_v52 = vadd.f32 %v208_v0, %v1202_v49  ;;  %v210_v53 = vpop.f32.mrb[1].mxu0  ;;  %v365_v54 = vadd.f32 %v364_v51, %v1202_v49  ;;  %v366_v55 = vpop.f32.mrb[1].mxu1 }
 0x11f   :  { %v211_v56 = vadd.f32 %v210_v53, %v1205_v50  ;;  %v367_v57 = vadd.f32 %v366_v55, %v1205_v50  ;;  %v1239_v53 = vrot.slane %v1198_v47, %v137_v41 }
 0x120   :  { %646 = vst [vmem:[#allocation7] sm:$0xff] %v209_v52  ;;  %724 = vst [vmem:[#allocation7 + $0x270] sm:$0xff] %v365_v54 }
 0x121   :  { %647 = vst [vmem:[#allocation7 + $0x8] sm:$0xff] %v211_v56  ;;  %v214_v58 = vpop.f32.mrb[2].mxu0  ;;  %725 = vst [vmem:[#allocation7 + $0x278] sm:$0xff] %v367_v57  ;;  %v370_v59 = vpop.f32.mrb[2].mxu1 }
 0x122   :  { %v215_v60 = vadd.f32 %v214_v58, %v1202_v49  ;;  %v216_v61 = vpop.f32.mrb[3].mxu0  ;;  %v371_v62 = vadd.f32 %v370_v59, %v1202_v49  ;;  %v372_v63 = vpop.f32.mrb[3].mxu1 }
 0x123   :  { %v217_v1 = vadd.f32 %v216_v61, %v1205_v50  ;;  %v373_v2 = vadd.f32 %v372_v63, %v1205_v50 }
 0x124   :  { %649 = vst [vmem:[#allocation7 + $0x18] sm:$0xff] %v215_v60  ;;  %727 = vst [vmem:[#allocation7 + $0x288] sm:$0xff] %v371_v62 }
 0x125   :  { %650 = vst [vmem:[#allocation7 + $0x20] sm:$0xff] %v217_v1  ;;  %v220_v3 = vpop.f32.mrb[4].mxu0  ;;  %728 = vst [vmem:[#allocation7 + $0x290] sm:$0xff] %v373_v2  ;;  %v376_v4 = vpop.f32.mrb[4].mxu1 }
 0x126   :  { %v221_v5 = vadd.f32 %v220_v3, %v1202_v49  ;;  %v222_v6 = vpop.f32.mrb[5].mxu0  ;;  %v377_v7 = vadd.f32 %v376_v4, %v1202_v49  ;;  %v378_v8 = vpop.f32.mrb[5].mxu1 }
 0x127   :  { %v223_v9 = vadd.f32 %v222_v6, %v1205_v50  ;;  %v379_v10 = vadd.f32 %v378_v8, %v1205_v50 }
 0x128   :  { %652 = vst [vmem:[#allocation7 + $0x30] sm:$0xff] %v221_v5  ;;  %730 = vst [vmem:[#allocation7 + $0x2a0] sm:$0xff] %v377_v7 }
 0x129   :  { %653 = vst [vmem:[#allocation7 + $0x38] sm:$0xff] %v223_v9  ;;  %v226_v11 = vpop.f32.mrb[6].mxu0  ;;  %731 = vst [vmem:[#allocation7 + $0x2a8] sm:$0xff] %v379_v10  ;;  %v382_v12 = vpop.f32.mrb[6].mxu1 }
 0x12a   :  { %v227_v13 = vadd.f32 %v226_v11, %v1202_v49  ;;  %v228_v14 = vpop.f32.mrb[7].mxu0  ;;  %v383_v15 = vadd.f32 %v382_v12, %v1202_v49  ;;  %v384_v16 = vpop.f32.mrb[7].mxu1 }
 0x12b   :  { %v229_v17 = vadd.f32 %v228_v14, %v1205_v50  ;;  %v385_v18 = vadd.f32 %v384_v16, %v1205_v50 }
 0x12c   :  { %655 = vst [vmem:[#allocation7 + $0x48] sm:$0xff] %v227_v13  ;;  %733 = vst [vmem:[#allocation7 + $0x2b8] sm:$0xff] %v383_v15 }
 0x12d   :  { %656 = vst [vmem:[#allocation7 + $0x50] sm:$0xff] %v229_v17  ;;  %v232_v19 = vpop.f32.mrb[8].mxu0  ;;  %734 = vst [vmem:[#allocation7 + $0x2c0] sm:$0xff] %v385_v18  ;;  %v388_v20 = vpop.f32.mrb[8].mxu1 }
 0x12e   :  { %v233_v21 = vadd.f32 %v232_v19, %v1202_v49  ;;  %v234_v22 = vpop.f32.mrb[9].mxu0  ;;  %v389_v23 = vadd.f32 %v388_v20, %v1202_v49  ;;  %v390_v24 = vpop.f32.mrb[9].mxu1 }
 0x12f   :  { %v235_v25 = vadd.f32 %v234_v22, %v1205_v50  ;;  %v391_v26 = vadd.f32 %v390_v24, %v1205_v50 }
 0x130   :  { %658 = vst [vmem:[#allocation7 + $0x60] sm:$0xff] %v233_v21  ;;  %736 = vst [vmem:[#allocation7 + $0x2d0] sm:$0xff] %v389_v23 }
 0x131   :  { %659 = vst [vmem:[#allocation7 + $0x68] sm:$0xff] %v235_v25  ;;  %v238_v27 = vpop.f32.mrb[10].mxu0  ;;  %737 = vst [vmem:[#allocation7 + $0x2d8] sm:$0xff] %v391_v26  ;;  %v394_v28 = vpop.f32.mrb[10].mxu1 }
 0x132   :  { %v239_v29 = vadd.f32 %v238_v27, %v1202_v49  ;;  %v240_v30 = vpop.f32.mrb[11].mxu0  ;;  %v395_v31 = vadd.f32 %v394_v28, %v1202_v49  ;;  %v396_v32 = vpop.f32.mrb[11].mxu1 }
 0x133   :  { %v241_v33 = vadd.f32 %v240_v30, %v1205_v50  ;;  %v397_v34 = vadd.f32 %v396_v32, %v1205_v50 }
 0x134   :  { %661 = vst [vmem:[#allocation7 + $0x78] sm:$0xff] %v239_v29  ;;  %739 = vst [vmem:[#allocation7 + $0x2e8] sm:$0xff] %v395_v31 }
 0x135   :  { %662 = vst [vmem:[#allocation7 + $0x80] sm:$0xff] %v241_v33  ;;  %v244_v35 = vpop.f32.mrb[12].mxu0  ;;  %740 = vst [vmem:[#allocation7 + $0x2f0] sm:$0xff] %v397_v34  ;;  %v400_v36 = vpop.f32.mrb[12].mxu1 }
 0x136   :  { %v245_v37 = vadd.f32 %v244_v35, %v1202_v49  ;;  %v246_v38 = vpop.f32.mrb[13].mxu0  ;;  %v401_v39 = vadd.f32 %v400_v36, %v1202_v49  ;;  %v402_v40 = vpop.f32.mrb[13].mxu1 }
 0x137   :  { %v247_v42 = vadd.f32 %v246_v38, %v1205_v50  ;;  %v403_v43 = vadd.f32 %v402_v40, %v1205_v50 }
 0x138   :  { %664 = vst [vmem:[#allocation7 + $0x90] sm:$0xff] %v245_v37  ;;  %742 = vst [vmem:[#allocation7 + $0x300] sm:$0xff] %v401_v39 }
 0x139   :  { %665 = vst [vmem:[#allocation7 + $0x98] sm:$0xff] %v247_v42  ;;  %v250_v44 = vpop.f32.mrb[14].mxu0  ;;  %743 = vst [vmem:[#allocation7 + $0x308] sm:$0xff] %v403_v43  ;;  %v406_v46 = vpop.f32.mrb[14].mxu1 }
 0x13a   :  { %v251_v48 = vadd.f32 %v250_v44, %v1202_v49  ;;  %v252_v0 = vpop.f32.mrb[15].mxu0  ;;  %v407_v51 = vadd.f32 %v406_v46, %v1202_v49  ;;  %v408_v52 = vpop.f32.mrb[15].mxu1 }
 0x13b   :  { %v253_v45 = vadd.f32 %v252_v0, %v1205_v50  ;;  %v409_v54 = vadd.f32 %v408_v52, %v1205_v50 }
 0x13c   :  { %667 = vst [vmem:[#allocation7 + $0xa8] sm:$0xff] %v251_v48  ;;  %745 = vst [vmem:[#allocation7 + $0x318] sm:$0xff] %v407_v51 }
 0x13d   :  { %668 = vst [vmem:[#allocation7 + $0xb0] sm:$0xff] %v253_v45  ;;  %v256_v55 = vpop.f32.mrb[16].mxu0  ;;  %746 = vst [vmem:[#allocation7 + $0x320] sm:$0xff] %v409_v54  ;;  %v850_v56 = vpop.f32.mrb[16].mxu1 }
 0x13e   :  { %v257_v57 = vadd.f32 %v256_v55, %v1202_v49  ;;  %v258_v58 = vpop.f32.mrb[17].mxu0  ;;  %v483_v59 = vadd.f32 %v850_v56, %v1239_v53  ;;  %v477_v60 = vpop.f32.mrb[17].mxu1 }
 0x13f   :  { %v259_v61 = vadd.f32 %v258_v58, %v1205_v50  ;;  %v478_v47 = vadd.f32 %v477_v60, %v1239_v53 }
 0x140   :  { %670 = vst [vmem:[#allocation7 + $0xc0] sm:$0xff] %v257_v57  ;;  %651 = vst [vmem:[#allocation7 + $0x28] sm:$0xff] %v483_v59 }
 0x141   :  { %671 = vst [vmem:[#allocation7 + $0xc8] sm:$0xff] %v259_v61  ;;  %v262_v62 = vpop.f32.mrb[18].mxu0  ;;  %648 = vst [vmem:[#allocation7 + $0x10] sm:$0xff] %v478_v47  ;;  %v853_v63 = vpop.f32.mrb[18].mxu1 }
 0x142   :  { %v263_v1 = vadd.f32 %v262_v62, %v1202_v49  ;;  %v264_v2 = vpop.f32.mrb[19].mxu0  ;;  %v493_v3 = vadd.f32 %v853_v63, %v1239_v53  ;;  %v487_v4 = vpop.f32.mrb[19].mxu1 }
 0x143   :  { %v265_v5 = vadd.f32 %v264_v2, %v1205_v50  ;;  %v488_v6 = vadd.f32 %v487_v4, %v1239_v53 }
 0x144   :  { %673 = vst [vmem:[#allocation7 + $0xd8] sm:$0xff] %v263_v1  ;;  %657 = vst [vmem:[#allocation7 + $0x58] sm:$0xff] %v493_v3 }
 0x145   :  { %674 = vst [vmem:[#allocation7 + $0xe0] sm:$0xff] %v265_v5  ;;  %v268_v7 = vpop.f32.mrb[20].mxu0  ;;  %654 = vst [vmem:[#allocation7 + $0x40] sm:$0xff] %v488_v6  ;;  %v856_v8 = vpop.f32.mrb[20].mxu1 }
 0x146   :  { %v269_v9 = vadd.f32 %v268_v7, %v1202_v49  ;;  %v270_v10 = vpop.f32.mrb[21].mxu0  ;;  %v503_v11 = vadd.f32 %v856_v8, %v1239_v53  ;;  %v497_v12 = vpop.f32.mrb[21].mxu1 }
 0x147   :  { %v271_v13 = vadd.f32 %v270_v10, %v1205_v50  ;;  %v498_v14 = vadd.f32 %v497_v12, %v1239_v53 }
 0x148   :  { %676 = vst [vmem:[#allocation7 + $0xf0] sm:$0xff] %v269_v9  ;;  %663 = vst [vmem:[#allocation7 + $0x88] sm:$0xff] %v503_v11 }
 0x149   :  { %677 = vst [vmem:[#allocation7 + $0xf8] sm:$0xff] %v271_v13  ;;  %v274_v15 = vpop.f32.mrb[22].mxu0  ;;  %660 = vst [vmem:[#allocation7 + $0x70] sm:$0xff] %v498_v14  ;;  %v859_v16 = vpop.f32.mrb[22].mxu1 }
 0x14a   :  { %v275_v17 = vadd.f32 %v274_v15, %v1202_v49  ;;  %v276_v18 = vpop.f32.mrb[23].mxu0  ;;  %v513_v19 = vadd.f32 %v859_v16, %v1239_v53  ;;  %v507_v20 = vpop.f32.mrb[23].mxu1 }
 0x14b   :  { %v277_v21 = vadd.f32 %v276_v18, %v1205_v50  ;;  %v508_v22 = vadd.f32 %v507_v20, %v1239_v53 }
 0x14c   :  { %679 = vst [vmem:[#allocation7 + $0x108] sm:$0xff] %v275_v17  ;;  %669 = vst [vmem:[#allocation7 + $0xb8] sm:$0xff] %v513_v19 }
 0x14d   :  { %680 = vst [vmem:[#allocation7 + $0x110] sm:$0xff] %v277_v21  ;;  %v280_v23 = vpop.f32.mrb[24].mxu0  ;;  %666 = vst [vmem:[#allocation7 + $0xa0] sm:$0xff] %v508_v22  ;;  %v862_v24 = vpop.f32.mrb[24].mxu1 }
 0x14e   :  { %v281_v25 = vadd.f32 %v280_v23, %v1202_v49  ;;  %v282_v26 = vpop.f32.mrb[25].mxu0  ;;  %v523_v27 = vadd.f32 %v862_v24, %v1239_v53  ;;  %v517_v28 = vpop.f32.mrb[25].mxu1 }
 0x14f   :  { %v283_v29 = vadd.f32 %v282_v26, %v1205_v50  ;;  %v518_v30 = vadd.f32 %v517_v28, %v1239_v53 }
 0x150   :  { %682 = vst [vmem:[#allocation7 + $0x120] sm:$0xff] %v281_v25  ;;  %675 = vst [vmem:[#allocation7 + $0xe8] sm:$0xff] %v523_v27 }
 0x151   :  { %683 = vst [vmem:[#allocation7 + $0x128] sm:$0xff] %v283_v29  ;;  %v286_v31 = vpop.f32.mrb[26].mxu0  ;;  %672 = vst [vmem:[#allocation7 + $0xd0] sm:$0xff] %v518_v30  ;;  %v865_v32 = vpop.f32.mrb[26].mxu1 }
 0x152   :  { %v287_v33 = vadd.f32 %v286_v31, %v1202_v49  ;;  %v288_v34 = vpop.f32.mrb[27].mxu0  ;;  %v533_v35 = vadd.f32 %v865_v32, %v1239_v53  ;;  %v527_v36 = vpop.f32.mrb[27].mxu1 }
 0x153   :  { %v289_v37 = vadd.f32 %v288_v34, %v1205_v50  ;;  %v528_v38 = vadd.f32 %v527_v36, %v1239_v53 }
 0x154   :  { %685 = vst [vmem:[#allocation7 + $0x138] sm:$0xff] %v287_v33  ;;  %681 = vst [vmem:[#allocation7 + $0x118] sm:$0xff] %v533_v35 }
 0x155   :  { %686 = vst [vmem:[#allocation7 + $0x140] sm:$0xff] %v289_v37  ;;  %v292_v39 = vpop.f32.mrb[28].mxu0  ;;  %678 = vst [vmem:[#allocation7 + $0x100] sm:$0xff] %v528_v38  ;;  %v868_v40 = vpop.f32.mrb[28].mxu1 }
 0x156   :  { %v293_v41 = vadd.f32 %v292_v39, %v1202_v49  ;;  %v294_v42 = vpop.f32.mrb[29].mxu0  ;;  %v543_v43 = vadd.f32 %v868_v40, %v1239_v53  ;;  %v537_v44 = vpop.f32.mrb[29].mxu1 }
 0x157   :  { %v295_v46 = vadd.f32 %v294_v42, %v1205_v50  ;;  %v538_v48 = vadd.f32 %v537_v44, %v1239_v53 }
 0x158   :  { %688 = vst [vmem:[#allocation7 + $0x150] sm:$0xff] %v293_v41  ;;  %687 = vst [vmem:[#allocation7 + $0x148] sm:$0xff] %v543_v43 }
 0x159   :  { %689 = vst [vmem:[#allocation7 + $0x158] sm:$0xff] %v295_v46  ;;  %v298_v0 = vpop.f32.mrb[30].mxu0  ;;  %684 = vst [vmem:[#allocation7 + $0x130] sm:$0xff] %v538_v48  ;;  %v871_v51 = vpop.f32.mrb[30].mxu1 }
 0x15a   :  { %v299_v52 = vadd.f32 %v298_v0, %v1202_v49  ;;  %v300_v45 = vpop.f32.mrb[31].mxu0  ;;  %v553_v54 = vadd.f32 %v871_v51, %v1239_v53  ;;  %v547_v55 = vpop.f32.mrb[31].mxu1 }
 0x15b   :  { %v301_v56 = vadd.f32 %v300_v45, %v1205_v50  ;;  %v548_v57 = vadd.f32 %v547_v55, %v1239_v53 }
 0x15c   :  { %691 = vst [vmem:[#allocation7 + $0x168] sm:$0xff] %v299_v52  ;;  %693 = vst [vmem:[#allocation7 + $0x178] sm:$0xff] %v553_v54 }
 0x15d   :  { %692 = vst [vmem:[#allocation7 + $0x170] sm:$0xff] %v301_v56  ;;  %v304_v58 = vpop.f32.mrb[32].mxu0  ;;  %690 = vst [vmem:[#allocation7 + $0x160] sm:$0xff] %v548_v57  ;;  %v874_v59 = vpop.f32.mrb[32].mxu1 }
 0x15e   :  { %v305_v60 = vadd.f32 %v304_v58, %v1202_v49  ;;  %v306_v61 = vpop.f32.mrb[33].mxu0  ;;  %v563_v47 = vadd.f32 %v874_v59, %v1239_v53  ;;  %v557_v62 = vpop.f32.mrb[33].mxu1 }
 0x15f   :  { %v307_v63 = vadd.f32 %v306_v61, %v1205_v50  ;;  %v558_v1 = vadd.f32 %v557_v62, %v1239_v53 }
 0x160   :  { %694 = vst [vmem:[#allocation7 + $0x180] sm:$0xff] %v305_v60  ;;  %699 = vst [vmem:[#allocation7 + $0x1a8] sm:$0xff] %v563_v47 }
 0x161   :  { %695 = vst [vmem:[#allocation7 + $0x188] sm:$0xff] %v307_v63  ;;  %v310_v2 = vpop.f32.mrb[34].mxu0  ;;  %696 = vst [vmem:[#allocation7 + $0x190] sm:$0xff] %v558_v1  ;;  %v877_v3 = vpop.f32.mrb[34].mxu1 }
 0x162   :  { %v311_v4 = vadd.f32 %v310_v2, %v1202_v49  ;;  %v312_v5 = vpop.f32.mrb[35].mxu0  ;;  %v573_v6 = vadd.f32 %v877_v3, %v1239_v53  ;;  %v567_v7 = vpop.f32.mrb[35].mxu1 }
 0x163   :  { %v313_v8 = vadd.f32 %v312_v5, %v1205_v50  ;;  %v568_v9 = vadd.f32 %v567_v7, %v1239_v53 }
 0x164   :  { %697 = vst [vmem:[#allocation7 + $0x198] sm:$0xff] %v311_v4  ;;  %705 = vst [vmem:[#allocation7 + $0x1d8] sm:$0xff] %v573_v6 }
 0x165   :  { %698 = vst [vmem:[#allocation7 + $0x1a0] sm:$0xff] %v313_v8  ;;  %v316_v10 = vpop.f32.mrb[36].mxu0  ;;  %702 = vst [vmem:[#allocation7 + $0x1c0] sm:$0xff] %v568_v9  ;;  %v880_v11 = vpop.f32.mrb[36].mxu1 }
 0x166   :  { %v317_v12 = vadd.f32 %v316_v10, %v1202_v49  ;;  %v318_v13 = vpop.f32.mrb[37].mxu0  ;;  %v583_v14 = vadd.f32 %v880_v11, %v1239_v53  ;;  %v577_v15 = vpop.f32.mrb[37].mxu1 }
 0x167   :  { %v319_v16 = vadd.f32 %v318_v13, %v1205_v50  ;;  %v578_v17 = vadd.f32 %v577_v15, %v1239_v53 }
 0x168   :  { %700 = vst [vmem:[#allocation7 + $0x1b0] sm:$0xff] %v317_v12  ;;  %711 = vst [vmem:[#allocation7 + $0x208] sm:$0xff] %v583_v14 }
 0x169   :  { %701 = vst [vmem:[#allocation7 + $0x1b8] sm:$0xff] %v319_v16  ;;  %v322_v18 = vpop.f32.mrb[38].mxu0  ;;  %708 = vst [vmem:[#allocation7 + $0x1f0] sm:$0xff] %v578_v17  ;;  %v883_v19 = vpop.f32.mrb[38].mxu1 }
 0x16a   :  { %v323_v20 = vadd.f32 %v322_v18, %v1202_v49  ;;  %v324_v21 = vpop.f32.mrb[39].mxu0  ;;  %v593_v22 = vadd.f32 %v883_v19, %v1239_v53  ;;  %v587_v23 = vpop.f32.mrb[39].mxu1 }
 0x16b   :  { %v325_v24 = vadd.f32 %v324_v21, %v1205_v50  ;;  %v588_v25 = vadd.f32 %v587_v23, %v1239_v53 }
 0x16c   :  { %703 = vst [vmem:[#allocation7 + $0x1c8] sm:$0xff] %v323_v20  ;;  %717 = vst [vmem:[#allocation7 + $0x238] sm:$0xff] %v593_v22 }
 0x16d   :  { %704 = vst [vmem:[#allocation7 + $0x1d0] sm:$0xff] %v325_v24  ;;  %v328_v26 = vpop.f32.mrb[40].mxu0  ;;  %714 = vst [vmem:[#allocation7 + $0x220] sm:$0xff] %v588_v25  ;;  %v886_v27 = vpop.f32.mrb[40].mxu1 }
 0x16e   :  { %v329_v28 = vadd.f32 %v328_v26, %v1202_v49  ;;  %v330_v29 = vpop.f32.mrb[41].mxu0  ;;  %v603_v30 = vadd.f32 %v886_v27, %v1239_v53  ;;  %v597_v31 = vpop.f32.mrb[41].mxu1 }
 0x16f   :  { %v331_v32 = vadd.f32 %v330_v29, %v1205_v50  ;;  %v598_v33 = vadd.f32 %v597_v31, %v1239_v53 }
 0x170   :  { %706 = vst [vmem:[#allocation7 + $0x1e0] sm:$0xff] %v329_v28  ;;  %723 = vst [vmem:[#allocation7 + $0x268] sm:$0xff] %v603_v30 }
 0x171   :  { %707 = vst [vmem:[#allocation7 + $0x1e8] sm:$0xff] %v331_v32  ;;  %v334_v34 = vpop.f32.mrb[42].mxu0  ;;  %720 = vst [vmem:[#allocation7 + $0x250] sm:$0xff] %v598_v33  ;;  %v889_v35 = vpop.f32.mrb[42].mxu1 }
 0x172   :  { %v335_v36 = vadd.f32 %v334_v34, %v1202_v49  ;;  %v336_v37 = vpop.f32.mrb[43].mxu0  ;;  %v613_v38 = vadd.f32 %v889_v35, %v1239_v53  ;;  %v607_v39 = vpop.f32.mrb[43].mxu1 }
 0x173   :  { %v337_v40 = vadd.f32 %v336_v37, %v1205_v50  ;;  %v608_v41 = vadd.f32 %v607_v39, %v1239_v53 }
 0x174   :  { %709 = vst [vmem:[#allocation7 + $0x1f8] sm:$0xff] %v335_v36  ;;  %729 = vst [vmem:[#allocation7 + $0x298] sm:$0xff] %v613_v38 }
 0x175   :  { %710 = vst [vmem:[#allocation7 + $0x200] sm:$0xff] %v337_v40  ;;  %v340_v42 = vpop.f32.mrb[44].mxu0  ;;  %726 = vst [vmem:[#allocation7 + $0x280] sm:$0xff] %v608_v41  ;;  %v892_v43 = vpop.f32.mrb[44].mxu1 }
 0x176   :  { %v341_v44 = vadd.f32 %v340_v42, %v1202_v49  ;;  %v342_v46 = vpop.f32.mrb[45].mxu0  ;;  %v623_v48 = vadd.f32 %v892_v43, %v1239_v53  ;;  %v617_v0 = vpop.f32.mrb[45].mxu1 }
 0x177   :  { %v343_v51 = vadd.f32 %v342_v46, %v1205_v50  ;;  %v618_v52 = vadd.f32 %v617_v0, %v1239_v53 }
 0x178   :  { %712 = vst [vmem:[#allocation7 + $0x210] sm:$0xff] %v341_v44  ;;  %735 = vst [vmem:[#allocation7 + $0x2c8] sm:$0xff] %v623_v48 }
 0x179   :  { %713 = vst [vmem:[#allocation7 + $0x218] sm:$0xff] %v343_v51  ;;  %v346_v45 = vpop.f32.mrb[46].mxu0  ;;  %732 = vst [vmem:[#allocation7 + $0x2b0] sm:$0xff] %v618_v52  ;;  %v895_v54 = vpop.f32.mrb[46].mxu1 }
 0x17a   :  { %v347_v55 = vadd.f32 %v346_v45, %v1202_v49  ;;  %v348_v56 = vpop.f32.mrb[47].mxu0  ;;  %v633_v57 = vadd.f32 %v895_v54, %v1239_v53  ;;  %v627_v58 = vpop.f32.mrb[47].mxu1 }
 0x17b   :  { %v349_v59 = vadd.f32 %v348_v56, %v1205_v50  ;;  %v628_v60 = vadd.f32 %v627_v58, %v1239_v53 }
 0x17c   :  { %715 = vst [vmem:[#allocation7 + $0x228] sm:$0xff] %v347_v55  ;;  %741 = vst [vmem:[#allocation7 + $0x2f8] sm:$0xff] %v633_v57 }
 0x17d   :  { %716 = vst [vmem:[#allocation7 + $0x230] sm:$0xff] %v349_v59  ;;  %v352_v61 = vpop.f32.mrb[48].mxu0  ;;  %738 = vst [vmem:[#allocation7 + $0x2e0] sm:$0xff] %v628_v60  ;;  %v898_v47 = vpop.f32.mrb[48].mxu1 }
 0x17e   :  { %v353_v62 = vadd.f32 %v352_v61, %v1202_v49  ;;  %v354_v63 = vpop.f32.mrb[49].mxu0  ;;  %v643_v1 = vadd.f32 %v898_v47, %v1239_v53  ;;  %v637_v2 = vpop.f32.mrb[49].mxu1 }
 0x17f   :  { %v355_v3 = vadd.f32 %v354_v63, %v1205_v50  ;;  %v638_v4 = vadd.f32 %v637_v2, %v1239_v53 }
 0x180   :  { %718 = vst [vmem:[#allocation7 + $0x240] sm:$0xff] %v353_v62  ;;  %747 = vst [vmem:[#allocation7 + $0x328] sm:$0xff] %v643_v1 }
 0x181   :  { %719 = vst [vmem:[#allocation7 + $0x248] sm:$0xff] %v355_v3  ;;  %v358_v5 = vpop.f32.mrb[50].mxu0  ;;  %744 = vst [vmem:[#allocation7 + $0x310] sm:$0xff] %v638_v4 }
 0x182   :  { %v359_v6 = vadd.f32 %v358_v5, %v1202_v49  ;;  %v360_v7 = vpop.f32.mrb[51].mxu0 }
 0x183   :  { %v361_v8 = vadd.f32 %v360_v7, %v1205_v50 }
 0x184   :  { %721 = vst [vmem:[#allocation7 + $0x258] sm:$0xff] %v359_v6 }
 0x185   :  { %722 = vst [vmem:[#allocation7 + $0x260] sm:$0xff] %v361_v8 }
 0x186   :  { %1042 = shalt.err (!%p1039_p6)
}
 0x187   :  { %s1043_s17 = scalar_lea.hbm %s1331_s3, 13056 }
 0x188   :  { %p1044_p7 = scmp.ne.s32.totalorder %s1331_s3, %s1043_s17  ;;  %p1047_p8 = scmp.lt.u32.totalorder %s1043_s17, %s1331_s3 }
 0x18a   :  { %p1049_p9 = pnand %p1047_p8, %p1044_p7 }
 0x18c   :  { %1052 = shalt.err (!%p1049_p9)
}
 0x18d   :  { %759 = dma.vmem_to_hbm [thread:$0]  %s754_s13, 13056, %s1331_s3, [#allocation4], %s1063_s0, %s1063_s0, %s1064_s9  }
 0x18e   :  { %1057 = dma.done.wait [#allocation4], 13056  }
 0x18f   :  { %1058 = vsyncadd [#allocation4], 4294954240 }
 0x190   :  { %763 = vsyncpa [#allocation3], 1 }
 0x191   :  { %764 = vsyncpa [#allocation6], 1 }
 0x192   :  { %765 = vsyncpa [#allocation4], 1 }

</bundles_post_ra>
